<compile_context>
chip_gen: v7x
topology: tpu7x:2x2x1
jax: 0.10.0
libtpu: 0.0.40
codegen_flags: <defaults>
</compile_context>

<pallas_src>
import jax
import jax.numpy as jnp
from jax.experimental import pallas as pl
from jax.experimental.pallas import tpu as pltpu


def _make_mean_prior_kernel(neg_inv_2l2: float):
    """Kernel over one (i, k) tile: i indexes N1 tiles, k indexes N2 tiles."""

    def kernel(x1t_ref, x2_ref, m_ref, o_ref, acc_ref):
        k = pl.program_id(1)

        @pl.when(k == 0)
        def _init():
            acc_ref[...] = jnp.zeros_like(acc_ref)

        x1t = x1t_ref[...]     # (D, tm)   x1 tile, pre-transposed in the wrapper
        x2 = x2_ref[...]       # (tn, D)   x2 tile
        m = m_ref[...]         # (tn, 1)   mean tile (variance already folded in)

        # Pairwise squared distances via ||a||^2 + ||b||^2 - 2 a.b  (MXU for a.b).
        sq1 = jnp.sum(x1t * x1t, axis=0, keepdims=True)     # (1, tm)  row
        sq2 = jnp.sum(x2 * x2, axis=-1, keepdims=True)      # (tn, 1)  column
        cross = jnp.dot(x2, x1t, preferred_element_type=jnp.float32)   # (tn, tm)
        d2 = jnp.maximum(sq2 + sq1 - 2.0 * cross, 0.0)      # (tn, tm)

        # RBF covariance tile (transposed layout: rows = x2, cols = x1). EUP-bound.
        cov_t = jnp.exp(d2 * neg_inv_2l2)                   # (tn, tm)

        # cova @ mean for this tile: VPU broadcast-mul + sublane reduce (XLU),
        # accumulated lane-dense — hides under the EUP bottleneck.
        acc_ref[...] += jnp.sum(cov_t * m, axis=0, keepdims=True)   # (1, tm)

        @pl.when(k == pl.num_programs(1) - 1)
        def _finalize():
            o_ref[...] = acc_ref[...].astype(o_ref.dtype)

    return kernel


def _round_up(x: int, m: int) -> int:
    return (x + m - 1) // m * m


def mean_prior(locations1, locations2, mean, *, variance=1.0, lengthscale=1.0,
               tm=128, tn=128):
    """Pallas implementation of MeanPrior.forward with an RBF covariance."""
    n1, d = locations1.shape
    n2, d2 = locations2.shape
    assert d == d2, "feature dims must match"
    assert mean.shape == (n2,), "mean must have shape (N2,)"

    # Pad N1/N2 up to tile multiples (padded x2 rows carry mean == 0, so they
    # contribute nothing; padded x1 rows are sliced off at the end).
    n1p = _round_up(n1, tm)
    n2p = _round_up(n2, tn)

    x1 = locations1.astype(jnp.float32)
    x2 = locations2.astype(jnp.float32)
    m = mean.astype(jnp.float32) * jnp.float32(variance)   # fold variance (O(N2))

    if n1p != n1:
        x1 = jnp.pad(x1, ((0, n1p - n1), (0, 0)))
    if n2p != n2:
        x2 = jnp.pad(x2, ((0, n2p - n2), (0, 0)))
        m = jnp.pad(m, (0, n2p - n2))

    x1t = x1.T                      # (D, N1p) — wrapper-side layout plumbing
    m_col = m.reshape(n2p, 1)       # (N2p, 1)

    neg_inv_2l2 = -0.5 / (float(lengthscale) * float(lengthscale))
    grid = (n1p // tm, n2p // tn)

    cost = pl.CostEstimate(
        flops=2 * n1p * n2p * d + 6 * n1p * n2p,
        transcendentals=n1p * n2p,
        bytes_accessed=4 * (n1p * d + n2p * d + n2p + n1p),
    )

    out = pl.pallas_call(
        _make_mean_prior_kernel(neg_inv_2l2),
        out_shape=jax.ShapeDtypeStruct((1, n1p), jnp.float32),
        grid_spec=pltpu.PrefetchScalarGridSpec(
            num_scalar_prefetch=0,
            grid=grid,
            in_specs=[
                pl.BlockSpec((d, tm), lambda i, k: (0, i)),    # x1^T tile
                pl.BlockSpec((tn, d), lambda i, k: (k, 0)),    # x2 tile
                pl.BlockSpec((tn, 1), lambda i, k: (k, 0)),    # mean tile
            ],
            out_specs=pl.BlockSpec((1, tm), lambda i, k: (0, i)),  # lane-dense row
            scratch_shapes=[pltpu.VMEM((1, tm), jnp.float32)],     # accumulator
        ),
        compiler_params=pltpu.CompilerParams(
            dimension_semantics=("parallel", "arbitrary"),
            vmem_limit_bytes=32 * 1024 * 1024,
        ),
        cost_estimate=cost,
    )(x1t, x2, m_col)

    return out[0, :n1]   # squeeze(-1) + drop padding


def _reference(locations1, locations2, mean, variance, lengthscale):
    d2 = jnp.sum(
        (locations1[:, None, :] - locations2[None, :, :]) ** 2, axis=-1
    )
    cov = variance * jnp.exp(-0.5 * d2 / (lengthscale ** 2))
    return cov @ mean


if __name__ == "__main__":
    key = jax.random.PRNGKey(0)
    k1, k2, k3 = jax.random.split(key, 3)

    # Small shapes; multiples of the 128-tile so the grid is (2, 2) and the
    # accumulator / reduction path is actually exercised.
    N1, N2, D = 256, 256, 8
    locations1 = jax.random.normal(k1, (N1, D), dtype=jnp.float32)
    locations2 = jax.random.normal(k2, (N2, D), dtype=jnp.float32)
    mean = jax.random.normal(k3, (N2,), dtype=jnp.float32)  # deterministic "parameter"

    variance, lengthscale = 1.3, 0.9

    out = mean_prior(locations1, locations2, mean,
                     variance=variance, lengthscale=lengthscale)
    out = jax.block_until_ready(out)

    ref = _reference(locations1, locations2, mean, variance, lengthscale)
    assert out.shape == (N1,)
    assert jnp.allclose(out, ref, atol=1e-3, rtol=1e-3)

    print("KERNEL_OK")
</pallas_src>

<mosaic_0001>
module attributes {stable_mosaic.version = 11 : i64} {
  func.func @kernel(%arg0: i32, %arg1: i32, %arg2: memref<8x128xf32, #tpu.memory_space<vmem>>, %arg3: memref<128x8xf32, #tpu.memory_space<vmem>>, %arg4: memref<128x1xf32, #tpu.memory_space<vmem>>, %arg5: memref<1x128xf32, #tpu.memory_space<vmem>>, %arg6: memref<1x128xf32, #tpu.memory_space<vmem>>) attributes {dimension_semantics = [#tpu.dimension_semantics<parallel>, #tpu.dimension_semantics<arbitrary>], iteration_bounds = array<i64: 2, 2>, scalar_prefetch = 0 : i64, scratch_operands = 1 : i64, tpu.core_type = #tpu.core_type<tc>, window_params = [{transform_indices = @transform_0, window_bounds = array<i64: 8, 128>}, {transform_indices = @transform_1, window_bounds = array<i64: 128, 8>}, {transform_indices = @transform_2, window_bounds = array<i64: 128, 1>}, {transform_indices = @transform_3, window_bounds = array<i64: 1, 128>}]} {
    %c0_i32 = arith.constant 0 : i32
    %0 = arith.cmpi eq, %arg1, %c0_i32 : i32
    %1 = arith.extui %0 : i1 to i32
    %c0_i32_0 = arith.constant 0 : i32
    %2 = arith.cmpi ne, %1, %c0_i32_0 : i32
    scf.if %2 {
      %cst_17 = arith.constant 0.000000e+00 : f32
      %34 = vector.broadcast %cst_17 : f32 to vector<1x128xf32>
      %c0_18 = arith.constant 0 : index
      %c0_19 = arith.constant 0 : index
      %35 = vector.load %arg6[%c0_18, %c0_19] : memref<1x128xf32, #tpu.memory_space<vmem>>, vector<1x128xf32>
      tpu.vector_store %arg6[%c0_18, %c0_19], %34 {strides = array<i32>} : memref<1x128xf32, #tpu.memory_space<vmem>>, vector<1x128xf32>,
    } else {
    }
    %c0 = arith.constant 0 : index
    %c0_1 = arith.constant 0 : index
    %3 = vector.load %arg2[%c0, %c0_1] : memref<8x128xf32, #tpu.memory_space<vmem>>, vector<8x128xf32>
    %c0_2 = arith.constant 0 : index
    %c0_3 = arith.constant 0 : index
    %4 = vector.load %arg3[%c0_2, %c0_3] : memref<128x8xf32, #tpu.memory_space<vmem>>, vector<128x8xf32>
    %c0_4 = arith.constant 0 : index
    %c0_5 = arith.constant 0 : index
    %5 = vector.load %arg4[%c0_4, %c0_5] : memref<128x1xf32, #tpu.memory_space<vmem>>, vector<128x1xf32>
    %6 = arith.mulf %3, %3 : vector<8x128xf32>
    %cst = arith.constant dense<0.000000e+00> : vector<128xf32>
    %7 = vector.multi_reduction <add>, %6, %cst [0] : vector<8x128xf32> to vector<128xf32>
    %8 = vector.shape_cast %7 : vector<128xf32> to vector<1x128xf32>
    %9 = arith.mulf %4, %4 : vector<128x8xf32>
    %cst_6 = arith.constant dense<0.000000e+00> : vector<128xf32>
    %10 = vector.multi_reduction <add>, %9, %cst_6 [1] : vector<128x8xf32> to vector<128xf32>
    %11 = vector.shape_cast %10 : vector<128xf32> to vector<128x1xf32>
    %cst_7 = arith.constant dense<0.000000e+00> : vector<128x128xf32>
    %12 = tpu.matmul %4, %3, %cst_7 {dimension_numbers = #tpu.dot_dimension_numbers<[1], [0], [0], [1], [0, 0, 1, 1], [], []>} : vector<128x8xf32>, vector<8x128xf32>, vector<128x128xf32> -> vector<128x128xf32>
    %13 = vector.broadcast %11 : vector<128x1xf32> to vector<128x128xf32>
    %14 = vector.broadcast %8 : vector<1x128xf32> to vector<128x128xf32>
    %15 = arith.addf %13, %14 : vector<128x128xf32>
    %cst_8 = arith.constant 2.000000e+00 : f32
    %16 = vector.broadcast %cst_8 : f32 to vector<128x128xf32>
    %17 = arith.mulf %16, %12 : vector<128x128xf32>
    %18 = arith.subf %15, %17 : vector<128x128xf32>
    %cst_9 = arith.constant 0.000000e+00 : f32
    %19 = vector.broadcast %cst_9 : f32 to vector<128x128xf32>
    %20 = arith.maximumf %18, %19 : vector<128x128xf32>
    %cst_10 = arith.constant -0.61728394 : f32
    %21 = vector.broadcast %cst_10 : f32 to vector<128x128xf32>
    %22 = arith.mulf %20, %21 : vector<128x128xf32>
    %23 = math.exp %22 : vector<128x128xf32>
    %c0_11 = arith.constant 0 : index
    %c0_12 = arith.constant 0 : index
    %24 = vector.load %arg6[%c0_11, %c0_12] : memref<1x128xf32, #tpu.memory_space<vmem>>, vector<1x128xf32>
    %25 = vector.broadcast %5 : vector<128x1xf32> to vector<128x128xf32>
    %26 = arith.mulf %23, %25 : vector<128x128xf32>
    %cst_13 = arith.constant dense<0.000000e+00> : vector<128xf32>
    %27 = vector.multi_reduction <add>, %26, %cst_13 [0] : vector<128x128xf32> to vector<128xf32>
    %28 = vector.shape_cast %27 : vector<128xf32> to vector<1x128xf32>
    %29 = arith.addf %24, %28 : vector<1x128xf32>
    %c0_14 = arith.constant 0 : index
    %c0_15 = arith.constant 0 : index
    %30 = vector.load %arg6[%c0_14, %c0_15] : memref<1x128xf32, #tpu.memory_space<vmem>>, vector<1x128xf32>
    tpu.vector_store %arg6[%c0_14, %c0_15], %29 {strides = array<i32>} : memref<1x128xf32, #tpu.memory_space<vmem>>, vector<1x128xf32>,
    %c1_i32 = arith.constant 1 : i32
    %31 = arith.cmpi eq, %arg1, %c1_i32 : i32
    %32 = arith.extui %31 : i1 to i32
    %c0_i32_16 = arith.constant 0 : i32
    %33 = arith.cmpi ne, %32, %c0_i32_16 : i32
    scf.if %33 {
      %c0_17 = arith.constant 0 : index
      %c0_18 = arith.constant 0 : index
      %34 = vector.load %arg6[%c0_17, %c0_18] : memref<1x128xf32, #tpu.memory_space<vmem>>, vector<1x128xf32>
      %c0_19 = arith.constant 0 : index
      %c0_20 = arith.constant 0 : index
      %35 = vector.load %arg5[%c0_19, %c0_20] : memref<1x128xf32, #tpu.memory_space<vmem>>, vector<1x128xf32>
      tpu.vector_store %arg5[%c0_19, %c0_20], %34 {strides = array<i32>} : memref<1x128xf32, #tpu.memory_space<vmem>>, vector<1x128xf32>,
    } else {
    }
    return
  }
  func.func @transform_0(%arg0: i32, %arg1: i32) -> (i32, i32) {
    %c0_i32 = arith.constant 0 : i32
    %c0_i32_0 = arith.constant 0 : i32
    return %c0_i32, %arg0 : i32, i32
  }
  func.func @transform_1(%arg0: i32, %arg1: i32) -> (i32, i32) {
    %c0_i32 = arith.constant 0 : i32
    %c0_i32_0 = arith.constant 0 : i32
    return %arg1, %c0_i32 : i32, i32
  }
  func.func @transform_2(%arg0: i32, %arg1: i32) -> (i32, i32) {
    %c0_i32 = arith.constant 0 : i32
    %c0_i32_0 = arith.constant 0 : i32
    return %arg1, %c0_i32 : i32, i32
  }
  func.func @transform_3(%arg0: i32, %arg1: i32) -> (i32, i32) {
    %c0_i32 = arith.constant 0 : i32
    %c0_i32_0 = arith.constant 0 : i32
    return %c0_i32, %arg0 : i32, i32
  }
}

</mosaic_0001>

<bundles_post_ra>
// kernel: tpu_custom_call.1
= control target key start
LH: loop header
LB: loop body
LE: loop exit
PB: predicated region body
PF: predicated region fallthrough
CT: control target
= control target key end

     0   :  { %8 = vsyncpa [#allocation4], 0  ;;  %s1473_s0 = inlined_call_operand.vmem [shape: f32[8,256], index: 0, kind: input, shape index: {}]   ;;  %s1474_s1 = inlined_call_operand.vmem [shape: f32[256,8], index: 1, kind: input, shape index: {}]   ;;  %s1475_s2 = inlined_call_operand.vmem [shape: f32[256,1], index: 2, kind: input, shape index: {}]   ;;  %s1476_s3 = inlined_call_operand.hbm [shape: f32[1,256], index: 3, kind: output, shape index: {}]  }
   0x1   :  { %10 = vsyncpa [#allocation4 + $0x1], 0  ;;  %s1167_s12 = smov 0   ;;  %s1169_s13 = smov 0  }
   0x2   :  { %s1171_s14 = smov 0   ;;  %s1173_s15 = smov 0  }
   0x3   :  { %s1175_s16 = smov 0   ;;  %s1177_s17 = smov 0  }
   0x4   :  { %s1179_s18 = smov 0   ;;  %s1181_s19 = smov 0  }
   0x5 LB: > { %s865_s20 = sadd.s32 4294967295, %s1142_s19   ;;  %s866_s21 = sadd.s32 4294967294, %s1142_s19   ;;  %s1142_s19 = sphi %s1181_s19, %s16_s19   ;;  %s1138_s18 = sphi %s1179_s18, %s1488_s18   ;;  %s1134_s17 = sphi %s1177_s17, %s1487_s17   ;;  %s1130_s16 = sphi %s1175_s16, %s1486_s16   ;;  %s1126_s15 = sphi %s1173_s15, %s1485_s15   ;;  %s1122_s14 = sphi %s1171_s14, %s1484_s14   ;;  %s1118_s13 = sphi %s1169_s13, %s1483_s13   ;;  %s1114_s12 = sphi %s1167_s12, %s1482_s12  }
   0x6   : > { %s25_s22 = sadd.s32 1, %s1134_s17  ;;  %s28_s23 = sadd.s32 1, %s1138_s18 }
   0x7   : > { %p26_p0 = scmp.ge.s32.totalorder %s25_s22, 2  ;;  %p123_p1 = scmp.ne.s32.totalorder %s1122_s14, %s1118_s13 }
   0x8   : > { %p124_p2 = scmp.eq.s32.totalorder %s865_s20, 3  ;;  %p129_p4 = scmp.ne.s32.totalorder %s1118_s13, %s1114_s12 }
   0x9   : > { %s1490_s22 = smov (%p26_p0, %s25_s22), 0  ;;  %s1492_s23 = smov (!%p26_p0, %s28_s23), %s1138_s18 }
   0xa   : > { %p1216_p3 = por %p124_p2, %p123_p1  ;;  %p30_p5 = scmp.ge.s32.totalorder %s1492_s23, 2 }
   0xb   : > { %p130_p6 = scmp.eq.s32.totalorder %s866_s21, 3  ;;  %p869_p7 = scmp.ge.s32.totalorder %s1142_s19, 1 }
   0xc   : > { %p173_p8 = scmp.lt.s32.totalorder %s1142_s19, 5  ;;  %s1494_s23 = smov (%p30_p5, %s1492_s23), 0 }
   0xd   : > { %1479 = sst [smem:[#allocation6_spill]] %s1494_s23  ;;  %p1226_p9 = por %p130_p6, %p129_p4 }
   0xe   : > { %p174_p10 = pnand %p869_p7, %p173_p8  ;;  %s110_s26 = ssub.s32 %s1138_s18, %s1494_s23 }
   0xf   : > { %s113_s27 = sadd.s32 1, %s1122_s14  ;;  %p111_p11 = scmp.eq.s32.totalorder %s110_s26, 0 }
  0x10   : > { %177 = sbr.rel (%p174_p10) target bundleno = 351 (0x15f), region = 32  ;;  %s203_s29 = sand.u32 (!%p174_p10), 1, %s1118_s13  }
  0x11   : > { %s1234_s28 = scalar_select %p111_p11, %s1122_s14, %s113_s27  }
  0x12   : > { %p205_p12 = scmp.lt.s32.totalorder (!%p174_p10), %s1130_s16, 1  ;;  %s871_s30 = sshll.u32 (!%p174_p10), %s1126_s15, 4 }
  0x13   : > { %p210_p13 = scmp.lt.s32.totalorder (!%p174_p10), %s871_s30, 31  ;;  %s1255_s23 = scalar_lea.vmem (!%p174_p10), [#allocation3], %s203_s29 }
  0x14   : > { %p875_p0 = scmp.ne.s32.totalorder (!%p174_p10), %s1126_s15, 0 }
  0x17   : > { %s206_s4 = scalar_select %p205_p12, %s1130_s16, 1 }
  0x18   : > { %s1496_s30 = smov (!%p210_p13, %s871_s30), 31  ;;  %224 = sbr.rel (%p875_p0) target bundleno = 31 (0x1f), region = 36 }
  0x19   : > { %s870_s5 = sshll.u32 %s206_s4, 3  ;;  %s872_s9 = sshll.u32 %s1496_s30, 3  ;;  %v1144_v0 = vmov (!%p875_p0), 0.0  }
  0x1a   : > { %s208_s8 = scalar_lea.vmem %s1473_s0, %s870_s5  ;;  %s1246_s20 = scalar_lea.vmem %s1474_s1, %s872_s9  ;;  %225 = vst [vmem:[#allocation2] sm:$0x1] (!%p875_p0), %v1144_v0 }
  0x1b   : > { %s1251_s27 = scalar_lea.vmem %s1475_s2, %s872_s9 }
  0x1f PF: > { %v1258_v1 = vld [vmem:[%s208_s8] sm:$0xff]  ;;  %vm282_vm0 = vcmask 64512   ;;  %v228_v5 = vld [vmem:[%s1246_s20 + $0x8] sm:$0xff]  ;;  %v229_v7 = vld [vmem:[%s1246_s20 + $0x10] sm:$0xff]  ;;  %v1145_v23 = vmov 0   ;;  %p892_p1 = scmp.ne.s32.totalorder %s1126_s15, 1 }
  0x20   : > { %v227_v2 = vld [vmem:[%s1246_s20] sm:$0xff]  ;;  %913 = vmatprep.subr.mxu0 %v1258_v1  ;;  %939 = vmatprep.subr.mxu1 %v1258_v1  ;;  %v236_v6 = vld [vmem:[%s1246_s20 + $0x48] sm:$0xff]  ;;  %v237_v8 = vld [vmem:[%s1246_s20 + $0x50] sm:$0xff]  ;;  %v268_v10 = vmul.f32 %v229_v7, %v229_v7  ;;  %v267_v13 = vmul.f32 %v228_v5, %v228_v5 }
  0x21   : > { %v235_v3 = vld [vmem:[%s1246_s20 + $0x40] sm:$0xff]  ;;  %v266_v4 = vmul.f32 %v227_v2, %v227_v2  ;;  %914 = vmatpush3.msra.mxu0 %v1258_v1  ;;  %940 = vmatpush3.msra.mxu1 %v1258_v1  ;;  %v230_v9 = vld [vmem:[%s1246_s20 + $0x18] sm:$0xff]  ;;  %v232_v18 = vld [vmem:[%s1246_s20 + $0x28] sm:$0xff]  ;;  %v275_v35 = vmul.f32 %v236_v6, %v236_v6  ;;  %v276_v40 = vmul.f32 %v237_v8, %v237_v8 }
  0x22   : > { %915 = vmatprep.mubr.msk.f32.mxu0 %vm282_vm0, %v227_v2  ;;  %927 = vmatprep.mubr.msk.f32.mxu1 %vm282_vm0, %v235_v3  ;;  %v269_v11 = vmul.f32 %v230_v9, %v230_v9  ;;  %v289_v14 = vsel %vm282_vm0, %v268_v10, 0.0  ;;  %v238_v15 = vld [vmem:[%s1246_s20 + $0x58] sm:$0xff]  ;;  %v231_v16 = vld [vmem:[%s1246_s20 + $0x20] sm:$0xff]  ;;  %v271_v20 = vmul.f32 %v232_v18, %v232_v18  ;;  %v286_v21 = vsel %vm282_vm0, %v267_v13, 0.0  ;;  %v240_v24 = vld [vmem:[%s1246_s20 + $0x68] sm:$0xff] }
  0x23   : > { %v283_v12 = vsel %vm282_vm0, %v266_v4, 0.0  ;;  %916 = vmatmul.mubr.msk.f32.vlgmr.msra.gmra.mrb[0].mxu0 %vm282_vm0, %v228_v5  ;;  %928 = vmatmul.mubr.msk.f32.vlgmr.msra.gmra.mrb[0].mxu1 %vm282_vm0, %v236_v6  ;;  %v239_v17 = vld [vmem:[%s1246_s20 + $0x60] sm:$0xff]  ;;  %v270_v22 = vmul.f32 %v231_v16, %v231_v16  ;;  %v233_v25 = vld [vmem:[%s1246_s20 + $0x30] sm:$0xff]  ;;  %v234_v27 = vld [vmem:[%s1246_s20 + $0x38] sm:$0xff]  ;;  %v274_v33 = vmul.f32 %v235_v3, %v235_v3  ;;  %v310_v37 = vsel %vm282_vm0, %v275_v35, 0.0 }
  0x24   : > { %918 = vmatprep.mubr.msk.f32.mxu0 %vm282_vm0, %v229_v7  ;;  %930 = vmatprep.mubr.msk.f32.mxu1 %vm282_vm0, %v237_v8  ;;  %v292_v19 = vsel %vm282_vm0, %v269_v11, 0.0  ;;  %v241_v26 = vld [vmem:[%s1246_s20 + $0x70] sm:$0xff]  ;;  %v298_v28 = vsel %vm282_vm0, %v271_v20, 0.0  ;;  %v273_v29 = vmul.f32 %v234_v27, %v234_v27  ;;  %v272_v31 = vmul.f32 %v233_v25, %v233_v25  ;;  %v242_v32 = vld [vmem:[%s1246_s20 + $0x78] sm:$0xff]  ;;  %v244_v51 = vld [vmem:[%s1251_s27 + $0x8] sm:$0xff] }
  0x25   : > { %290 = vadd.xlane.f32.xlu1 %v289_v14  ;;  %284 = vadd.xlane.f32.xlu0 %v283_v12  ;;  %v295_v30 = vsel %vm282_vm0, %v270_v22, 0.0  ;;  %v277_v38 = vmul.f32 %v238_v15, %v238_v15  ;;  %v307_v39 = vsel %vm282_vm0, %v274_v33, 0.0  ;;  %v279_v42 = vmul.f32 %v240_v24, %v240_v24  ;;  %v245_v52 = vld [vmem:[%s1251_s27 + $0x10] sm:$0xff]  ;;  %v243_v53 = vld [vmem:[%s1251_s27] sm:$0xff]  ;;  %v246_v54 = vld [vmem:[%s1251_s27 + $0x18] sm:$0xff] }
  0x26   : > { %1015 = vset.pattern.permute.xlu1 %v1145_v23  ;;  %1014 = vset.pattern.permute.xlu0 %v1145_v23  ;;  %v304_v34 = vsel %vm282_vm0, %v273_v29, 0.0  ;;  %v301_v36 = vsel %vm282_vm0, %v272_v31, 0.0  ;;  %v313_v43 = vsel %vm282_vm0, %v276_v40, 0.0  ;;  %v278_v44 = vmul.f32 %v239_v17, %v239_v17  ;;  %v252_v55 = vld [vmem:[%s1251_s27 + $0x48] sm:$0xff]  ;;  %v247_v56 = vld [vmem:[%s1251_s27 + $0x20] sm:$0xff]  ;;  %v254_v57 = vld [vmem:[%s1251_s27 + $0x58] sm:$0xff] }
  0x27   : > { %919 = vmatmul.mubr.msk.f32.gmra.mrb[2].mxu0 %vm282_vm0, %v230_v9  ;;  %931 = vmatmul.mubr.msk.f32.gmra.mrb[2].mxu1 %vm282_vm0, %v238_v15  ;;  %v316_v41 = vsel %vm282_vm0, %v277_v38, 0.0  ;;  %v322_v45 = vsel %vm282_vm0, %v279_v42, 0.0  ;;  %v281_v46 = vmul.f32 %v242_v32, %v242_v32  ;;  %v280_v48 = vmul.f32 %v241_v26, %v241_v26  ;;  %v248_v58 = vld [vmem:[%s1251_s27 + $0x28] sm:$0xff]  ;;  %v249_v60 = vld [vmem:[%s1251_s27 + $0x30] sm:$0xff]  ;;  %v258_v61 = vld [vmem:[%s1251_s27 + $0x78] sm:$0xff] }
  0x28   : > { %921 = vmatprep.mubr.msk.f32.mxu0 %vm282_vm0, %v231_v16  ;;  %933 = vmatprep.mubr.msk.f32.mxu1 %vm282_vm0, %v239_v17  ;;  %v319_v47 = vsel %vm282_vm0, %v278_v44, 0.0  ;;  %v256_v59 = vld [vmem:[%s1251_s27 + $0x68] sm:$0xff]  ;;  %v250_v62 = vld [vmem:[%s1251_s27 + $0x38] sm:$0xff]  ;;  %v251_v63 = vld [vmem:[%s1251_s27 + $0x40] sm:$0xff]  ;;  %v259_v10 = vmul.f32 %v1258_v1, %v1258_v1 }
  0x29   : > { %293 = vadd.xlane.f32.xlu1 %v292_v19  ;;  %287 = vadd.xlane.f32.xlu0 %v286_v21  ;;  %v328_v49 = vsel %vm282_vm0, %v281_v46, 0.0  ;;  %v325_v50 = vsel %vm282_vm0, %v280_v48, 0.0  ;;  %v253_v0 = vld [vmem:[%s1251_s27 + $0x50] sm:$0xff]  ;;  %v255_v2 = vld [vmem:[%s1251_s27 + $0x60] sm:$0xff] }
  0x2a   : > { %v257_v3 = vld [vmem:[%s1251_s27 + $0x70] sm:$0xff]  ;;  %v260_v12 = vrot.slane %v259_v10, 4 }
  0x2b   : > { %922 = vmatmul.mubr.msk.f32.gmra.mrb[4].mxu0 %vm282_vm0, %v232_v18  ;;  %934 = vmatmul.mubr.msk.f32.gmra.mrb[4].mxu1 %vm282_vm0, %v240_v24 }
  0x2c   : > { %924 = vmatprep.mubr.msk.f32.mxu0 %vm282_vm0, %v233_v25  ;;  %936 = vmatprep.mubr.msk.f32.mxu1 %vm282_vm0, %v241_v26  ;;  %v261_v15 = vadd.f32 %v260_v12, %v259_v10 }
  0x2d   : > { %299 = vadd.xlane.f32.xlu1 %v298_v28  ;;  %296 = vadd.xlane.f32.xlu0 %v295_v30 }
  0x2e   : > { %v262_v17 = vrot.slane %v261_v15, 2 }
  0x2f   : > { %925 = vmatmul.mubr.msk.f32.gmra.mrb[6].mxu0 %vm282_vm0, %v234_v27  ;;  %937 = vmatmul.mubr.msk.f32.gmra.mrb[6].mxu1 %vm282_vm0, %v242_v32 }
  0x30   : > { %v263_v19 = vadd.f32 %v262_v17, %v261_v15 }
  0x31   : > { %305 = vadd.xlane.f32.xlu1 %v304_v34  ;;  %302 = vadd.xlane.f32.xlu0 %v301_v36 }
  0x32   : > { %v264_v22 = vrot.slane %v263_v19, 1 }
  0x34   : > { %v1342_v24 = vadd.f32 %v264_v22, %v263_v19 }
  0x35   : > { %311 = vadd.xlane.f32.xlu1 %v310_v37  ;;  %308 = vadd.xlane.f32.xlu0 %v307_v39 }
  0x39   : > { %317 = vadd.xlane.f32.xlu1 %v316_v41  ;;  %314 = vadd.xlane.f32.xlu0 %v313_v43 }
  0x3d   : > { %323 = vadd.xlane.f32.xlu1 %v322_v45  ;;  %320 = vadd.xlane.f32.xlu0 %v319_v47 }
  0x41   : > { %329 = vadd.xlane.f32.xlu1 %v328_v49  ;;  %326 = vadd.xlane.f32.xlu0 %v325_v50 }
  0x52   : > { %644 = vperm.xlu1 %1015, %v244_v51  }
  0x56   : > { %649 = vperm.xlu1 %1015, %v245_v52  }
  0x57   : > { %639 = vperm.xlu0 %1014, %v243_v53  }
  0x5a   : > { %654 = vperm.xlu1 %1015, %v246_v54  }
  0x5b   : > { %684 = vperm.xlu0 %1014, %v252_v55  }
  0x5e   : > { %659 = vperm.xlu1 %1015, %v247_v56  }
  0x5f   : > { %694 = vperm.xlu0 %1014, %v254_v57  }
  0x62   : > { %664 = vperm.xlu1 %1015, %v248_v58  }
  0x63   : > { %704 = vperm.xlu0 %1014, %v256_v59  }
  0x66   : > { %669 = vperm.xlu1 %1015, %v249_v60  }
  0x67   : > { %714 = vperm.xlu0 %1014, %v258_v61  }
  0x6a   : > { %674 = vperm.xlu1 %1015, %v250_v62  }
  0x6e   : > { %679 = vperm.xlu1 %1015, %v251_v63  }
  0x72   : > { %689 = vperm.xlu1 %1015, %v253_v0  }
  0x76   : > { %699 = vperm.xlu1 %1015, %v255_v2  }
  0x7a   : > { %709 = vperm.xlu1 %1015, %v257_v3  }
  0xb2   : > { %v291_v4 = vpop.xlane.xlu1 %290  ;;  %v285_v9 = vpop.xlane.xlu0 %284 }
  0xb3   : > { %v524_v34 = vadd.f32 %v285_v9, %v1342_v24  ;;  %v526_v52 = vadd.f32 %v291_v4, %v1342_v24 }
  0xb6   : > { %v294_v5 = vpop.xlane.xlu1 %293  ;;  %v288_v13 = vpop.xlane.xlu0 %287 }
  0xb7   : > { %v525_v29 = vadd.f32 %v288_v13, %v1342_v24  ;;  %v527_v40 = vadd.f32 %v294_v5, %v1342_v24 }
  0xba   : > { %v1328_v6 = vpop.xlane.xlu1 %299  ;;  %v1334_v16 = vpop.xlane.xlu0 %296 }
  0xbe   : > { %v1330_v7 = vpop.xlane.xlu1 %305  ;;  %v1338_v20 = vpop.xlane.xlu0 %302 }
  0xc2   : > { %v312_v8 = vpop.xlane.xlu1 %311  ;;  %v309_v23 = vpop.xlane.xlu0 %308 }
  0xc3   : > { %v1347_v25 = vadd.f32 %v309_v23, %v1342_v24  ;;  %v1350_v28 = vadd.f32 %v312_v8, %v1342_v24  ;;  %v529_v8 = vadd.f32 %v1328_v6, %v1342_v24 }
  0xc6   : > { %v318_v11 = vpop.xlane.xlu1 %317  ;;  %v315_v37 = vpop.xlane.xlu0 %314 }
  0xc7   : > { %v1362_v41 = vadd.f32 %v315_v37, %v1342_v24  ;;  %v1367_v46 = vadd.f32 %v318_v11, %v1342_v24 }
  0xca   : > { %v324_v14 = vpop.xlane.xlu1 %323  ;;  %v321_v9 = vpop.xlane.xlu0 %320 }
  0xcb   : > { %v1383_v13 = vadd.f32 %v324_v14, %v1342_v24  ;;  %v536_v23 = vadd.f32 %v321_v9, %v1342_v24 }
  0xce   : > { %v1336_v18 = vpop.xlane.xlu1 %329 }
  0xd2   : > { %v1340_v21 = vpop.permute.xlu1 %644 }
  0xd6   : > { %v1344_v1 = vpop.permute.xlu1 %649 }
  0xda   : > { %v1372_v53 = vpop.permute.xlu1 %654 }
  0xde   : > { %v1385_v15 = vpop.permute.xlu1 %659 }
  0xf6   : > { %v917_v26 = vpop.f32.mrb[0].mxu0  ;;  %v929_v27 = vpop.f32.mrb[0].mxu1 }
  0xf7   : > { %v541_v30 = vmul.f32 2.0, %v917_v26  ;;  %v1353_v31 = vmul.f32 2.0, %v929_v27  ;;  %v445_v32 = vpop.f32.mrb[1].mxu0  ;;  %v485_v33 = vpop.f32.mrb[1].mxu1 }
  0xf8   : > { %v540_v35 = vmul.f32 2.0, %v445_v32  ;;  %v1356_v36 = vmul.f32 2.0, %v485_v33 }
  0xf9   : > { %v557_v38 = vsub.f32 %v525_v29, %v541_v30  ;;  %v565_v39 = vsub.f32 %v1350_v28, %v1353_v31  ;;  %v528_v29 = vadd.f32 %v1334_v16, %v1342_v24  ;;  %v327_v16 = vpop.xlane.xlu0 %326 }
  0xfa   : > { %v556_v42 = vsub.f32 %v524_v34, %v540_v35  ;;  %v564_v43 = vsub.f32 %v1347_v25, %v1356_v36  ;;  %v920_v44 = vpop.f32.mrb[2].mxu0  ;;  %v932_v45 = vpop.f32.mrb[2].mxu1  ;;  %v531_v34 = vadd.f32 %v1330_v7, %v1342_v24 }
  0xfb   : > { %v573_v47 = vmax.f32 %v557_v38, 0.0  ;;  %v543_v48 = vmul.f32 2.0, %v920_v44  ;;  %v1369_v49 = vmul.f32 2.0, %v932_v45  ;;  %v455_v50 = vpop.f32.mrb[3].mxu0  ;;  %v495_v51 = vpop.f32.mrb[3].mxu1  ;;  %v1398_v38 = vadd.f32 %v1336_v18, %v1342_v24 }
  0xfc   : > { %v572_v54 = vmax.f32 %v556_v42, 0.0  ;;  %v542_v55 = vmul.f32 2.0, %v455_v50  ;;  %v1374_v56 = vmul.f32 2.0, %v495_v51  ;;  %v1401_v7 = vpop.permute.xlu1 %664  ;;  %v530_v51 = vadd.f32 %v1338_v20, %v1342_v24 }
  0xfd   : > { %v589_v57 = vmul.f32 -0.61728394, %v573_v47  ;;  %v559_v58 = vsub.f32 %v527_v40, %v543_v48  ;;  %v567_v59 = vsub.f32 %v1367_v46, %v1369_v49  ;;  %v580_v47 = vmax.f32 %v564_v43, 0.0 }
  0xfe   : > { %v588_v60 = vmul.f32 -0.61728394, %v572_v54  ;;  %v558_v61 = vsub.f32 %v526_v52, %v542_v55  ;;  %v566_v62 = vsub.f32 %v1362_v41, %v1374_v56  ;;  %v923_v63 = vpop.f32.mrb[4].mxu0  ;;  %v935_v0 = vpop.f32.mrb[4].mxu1  ;;  %v538_v54 = vadd.f32 %v327_v16, %v1342_v24 }
  0xff   : > { %v606_v2 = vmul.f32 1.442695, %v589_v57  ;;  %v575_v3 = vmax.f32 %v559_v58, 0.0  ;;  %v545_v11 = vmul.f32 2.0, %v923_v63  ;;  %v465_v12 = vpop.f32.mrb[5].mxu0  ;;  %v1387_v19 = vmul.f32 2.0, %v935_v0 }
 0x100   : > { %v604_v4 = vmul.f32 1.442695, %v588_v60  ;;  %v574_v5 = vmax.f32 %v558_v61, 0.0  ;;  %v505_v22 = vpop.f32.mrb[5].mxu1  ;;  %v544_v36 = vmul.f32 2.0, %v465_v12  ;;  %v581_v43 = vmax.f32 %v565_v39, 0.0 }
 0x101   : > { %1016 = vpow2.f32 %v606_v2  ;;  %v591_v10 = vmul.f32 -0.61728394, %v575_v3  ;;  %v561_v26 = vsub.f32 %v529_v8, %v545_v11  ;;  %v569_v14 = vsub.f32 %v1383_v13, %v1387_v19  ;;  %v670_v11 = vpop.permute.xlu1 %669 }
 0x102   : > { %v590_v17 = vmul.f32 -0.61728394, %v574_v5  ;;  %1018 = vpow2.f32 %v604_v4  ;;  %v926_v6 = vpop.f32.mrb[6].mxu0  ;;  %v938_v27 = vpop.f32.mrb[6].mxu1  ;;  %v552_v37 = vmul.f32 2.0, %v505_v22  ;;  %v560_v44 = vsub.f32 %v528_v29, %v544_v36 }
 0x103   : > { %v610_v25 = vmul.f32 1.442695, %v591_v10  ;;  %v475_v32 = vpop.f32.mrb[7].mxu0  ;;  %v515_v33 = vpop.f32.mrb[7].mxu1  ;;  %v577_v35 = vmax.f32 %v561_v26, 0.0  ;;  %v547_v40 = vmul.f32 2.0, %v926_v6 }
 0x104   : > { %v608_v30 = vmul.f32 1.442695, %v590_v17  ;;  %v555_v41 = vmul.f32 2.0, %v938_v27  ;;  %v568_v45 = vsub.f32 %v536_v23, %v552_v37  ;;  %v576_v52 = vmax.f32 %v560_v44, 0.0  ;;  %v640_v4 = vpop.permute.xlu0 %639 }
 0x105   : > { %1020 = vpow2.f32 %v610_v25  ;;  %v593_v42 = vmul.f32 -0.61728394, %v577_v35  ;;  %v563_v48 = vsub.f32 %v531_v34, %v547_v40  ;;  %v546_v18 = vmul.f32 2.0, %v475_v32  ;;  %v675_v49 = vpop.permute.xlu1 %674 }
 0x106   : > { %1022 = vpow2.f32 %v608_v30  ;;  %v571_v50 = vsub.f32 %v1398_v38, %v555_v41  ;;  %v554_v57 = vmul.f32 2.0, %v515_v33  ;;  %v592_v60 = vmul.f32 -0.61728394, %v576_v52 }
 0x107   : > { %v614_v55 = vmul.f32 1.442695, %v593_v42  ;;  %v579_v56 = vmax.f32 %v563_v48, 0.0  ;;  %v562_v61 = vsub.f32 %v530_v51, %v546_v18  ;;  %v596_v63 = vmul.f32 -0.61728394, %v580_v47 }
 0x108   : > { %v582_v20 = vmax.f32 %v566_v62, 0.0  ;;  %v612_v5 = vmul.f32 1.442695, %v592_v60  ;;  %v570_v10 = vsub.f32 %v538_v54, %v554_v57  ;;  %v597_v12 = vmul.f32 -0.61728394, %v581_v43  ;;  %v685_v47 = vpop.permute.xlu0 %684 }
 0x109   : > { %v595_v2 = vmul.f32 -0.61728394, %v579_v56  ;;  %v578_v8 = vmax.f32 %v562_v61, 0.0  ;;  %1024 = vpow2.f32 %v614_v55  ;;  %v583_v28 = vmax.f32 %v567_v59, 0.0  ;;  %v680_v40 = vpop.permute.xlu1 %679 }
 0x10a   : > { %1026 = vpow2.f32 %v612_v5  ;;  %v598_v62 = vmul.f32 -0.61728394, %v582_v20  ;;  %v584_v19 = vmax.f32 %v568_v45, 0.0  ;;  %v622_v25 = vmul.f32 1.442695, %v597_v12 }
 0x10b   : > { %v1017_v58 = vpop.eup %1016  ;;  %v618_v9 = vmul.f32 1.442695, %v595_v2  ;;  %v594_v31 = vmul.f32 -0.61728394, %v578_v8  ;;  %v599_v26 = vmul.f32 -0.61728394, %v583_v28 }
 0x10c   : > { %v718_v0 = vmul.f32 %v1017_v58, %v1340_v21  ;;  %v1019_v3 = vpop.eup %1018  ;;  %v620_v21 = vmul.f32 1.442695, %v596_v63  ;;  %v585_v6 = vmax.f32 %v569_v14, 0.0  ;;  %v624_v59 = vmul.f32 1.442695, %v598_v62 }
 0x10d   : > { %v717_v24 = vmul.f32 %v1019_v3, %v640_v4  ;;  %v616_v22 = vmul.f32 1.442695, %v594_v31  ;;  %1028 = vpow2.f32 %v618_v9  ;;  %v600_v29 = vmul.f32 -0.61728394, %v584_v19  ;;  %v690_v56 = vpop.permute.xlu1 %689 }
 0x10e   : > { %v586_v30 = vmax.f32 %v570_v10, 0.0  ;;  %v626_v33 = vmul.f32 1.442695, %v599_v26  ;;  %v601_v34 = vmul.f32 -0.61728394, %v585_v6  ;;  %v587_v35 = vmax.f32 %v571_v50, 0.0 }
 0x10f   : > { %v1021_v39 = vpop.eup %1020  ;;  %v733_v13 = vadd.f32 %v718_v0, %v717_v24  ;;  %1030 = vpow2.f32 %v616_v22  ;;  %v628_v37 = vmul.f32 1.442695, %v600_v29 }
 0x110   : > { %v1023_v17 = vpop.eup %1022  ;;  %v720_v27 = vmul.f32 %v1021_v39, %v1372_v53  ;;  %1032 = vpow2.f32 %v620_v21  ;;  %v602_v38 = vmul.f32 -0.61728394, %v586_v30  ;;  %v630_v53 = vmul.f32 1.442695, %v601_v34 }
 0x111   : > { %v719_v23 = vmul.f32 %v1023_v17, %v1344_v1  ;;  %1034 = vpow2.f32 %v622_v25  ;;  %v603_v41 = vmul.f32 -0.61728394, %v587_v35  ;;  %v700_v20 = vpop.permute.xlu1 %699 }
 0x112   : > { %1036 = vpow2.f32 %v624_v59  ;;  %v632_v48 = vmul.f32 1.442695, %v602_v38 }
 0x113   : > { %v734_v46 = vadd.f32 %v733_v13, %v719_v23  ;;  %v1025_v36 = vpop.eup %1024  ;;  %1038 = vpow2.f32 %v626_v33  ;;  %v634_v18 = vmul.f32 1.442695, %v603_v41 }
 0x114   : > { %v1027_v1 = vpop.eup %1026  ;;  %v722_v42 = vmul.f32 %v1025_v36, %v1401_v7  ;;  %1040 = vpow2.f32 %v628_v37  ;;  %v695_v7 = vpop.permute.xlu0 %694 }
 0x115   : > { %v735_v32 = vadd.f32 %v734_v46, %v720_v27  ;;  %v721_v14 = vmul.f32 %v1027_v1, %v1385_v15  ;;  %1042 = vpow2.f32 %v630_v53  ;;  %v710_v39 = vpop.permute.xlu1 %709  ;;  %v636_v46 = vld [vmem:[#allocation2] sm:$0x1] }
 0x116   : > { %1044 = vpow2.f32 %v632_v48 }
 0x117   : > { %v1029_v16 = vpop.eup %1028  ;;  %v736_v44 = vadd.f32 %v735_v32, %v721_v14  ;;  %1046 = vpow2.f32 %v634_v18 }
 0x118   : > { %v724_v54 = vmul.f32 %v1029_v16, %v675_v49  ;;  %v705_v24 = vpop.permute.xlu0 %704 }
 0x119   : > { %v1031_v45 = vpop.eup %1030  ;;  %v737_v51 = vadd.f32 %v736_v44, %v722_v42 }
 0x11a   : > { %v723_v50 = vmul.f32 %v1031_v45, %v670_v11  ;;  %v1033_v52 = vpop.eup %1032 }
 0x11b   : > { %v1035_v15 = vpop.eup %1034  ;;  %v725_v57 = vmul.f32 %v1033_v52, %v680_v40 }
 0x11c   : > { %v738_v55 = vadd.f32 %v737_v51, %v723_v50  ;;  %v1037_v43 = vpop.eup %1036  ;;  %v726_v60 = vmul.f32 %v1035_v15, %v685_v47  ;;  %v715_v17 = vpop.permute.xlu0 %714 }
 0x11d   : > { %v1039_v63 = vpop.eup %1038  ;;  %v727_v0 = vmul.f32 %v1037_v43, %v690_v56 }
 0x11e   : > { %v739_v58 = vadd.f32 %v738_v55, %v724_v54  ;;  %v1041_v3 = vpop.eup %1040  ;;  %v728_v4 = vmul.f32 %v1039_v63, %v695_v7 }
 0x11f   : > { %v1043_v8 = vpop.eup %1042  ;;  %v729_v10 = vmul.f32 %v1041_v3, %v700_v20 }
 0x120   : > { %v740_v61 = vadd.f32 %v739_v58, %v725_v57  ;;  %v1045_v11 = vpop.eup %1044  ;;  %v730_v12 = vmul.f32 %v1043_v8, %v705_v24 }
 0x121   : > { %v1047_v31 = vpop.eup %1046  ;;  %v731_v13 = vmul.f32 %v1045_v11, %v710_v39 }
 0x122   : > { %v741_v2 = vadd.f32 %v740_v61, %v726_v60  ;;  %v732_v62 = vmul.f32 %v1047_v31, %v715_v17 }
 0x124   : > { %v742_v5 = vadd.f32 %v741_v2, %v727_v0 }
 0x126   : > { %v743_v9 = vadd.f32 %v742_v5, %v728_v4 }
 0x128   : > { %v744_v28 = vadd.f32 %v743_v9, %v729_v10 }
 0x12a   : > { %v745_v21 = vadd.f32 %v744_v28, %v730_v12 }
 0x12c   : > { %v746_v19 = vadd.f32 %v745_v21, %v731_v13 }
 0x12e   : > { %v747_v22 = vadd.f32 %v746_v19, %v732_v62 }
 0x130   : > { %v748_v23 = vrot.slane %v747_v22, 4 }
 0x132   : > { %v749_v25 = vadd.f32 %v748_v23, %v747_v22 }
 0x134   : > { %v750_v26 = vrot.slane %v749_v25, 2 }
 0x136   : > { %v751_v6 = vadd.f32 %v750_v26, %v749_v25 }
 0x138   : > { %v752_v27 = vrot.slane %v751_v6, 1  ;;  %759 = sbr.rel (%p892_p1) target bundleno = 327 (0x147), region = 40 }
 0x13a   : > { %v753_v49 = vadd.f32 %v752_v27, %v751_v6 }
 0x13c   : > { %v754_v59 = vadd.f32 %v753_v49, %v636_v46 }
 0x13e   : > { %755 = vst [vmem:[#allocation2] sm:$0x1] %v754_v59 }
 0x145   : > { %v760_v29 = vld [vmem:[#allocation2] sm:$0x1] }
 0x146   : > { %761 = vst [vmem:[%s1255_s23] sm:$0x1] %v760_v29 }
 0x147 PF: > { %s893_s30 = sshll.u32 %s1130_s16, 4  ;;  %s775_s7 = sshll.u32 %s1255_s23, 4  ;;  %s776_s7 = int_to_ptr.vmem [resolvable:$true] %s775_s7 }
 0x148   : > { %s1423_s6 = scalar_lea.hbm %s1476_s3, %s893_s30  ;;  %s763_s8 = scalar_lea.sflag [#allocation4], %s203_s29 }
 0x149   : > { %s1048_s15 = scalar_lea.vmem %s776_s7, 16  ;;  %s1146_s9 = smov [#allocation3]  }
 0x14a   : > { %p1049_p2 = scmp.ne.s32.totalorder %s776_s7, %s1048_s15  ;;  %s1052_s10 = sshll.u32 %s1146_s9, 4  ;;  %s1053_s10 = int_to_ptr.vmem [resolvable:$false] %s1052_s10 }
 0x14b   : > { %s1054_s11 = scalar_lea.vmem %s1053_s10, 32  ;;  %p1055_p6 = scmp.lt.s32.totalorder %s776_s7, %s1053_s10 }
 0x14c   : > { %p1050_p4 = pnand %p1049_p2, %p1216_p3  ;;  %p1056_p7 = scmp.lt.s32.totalorder %s1054_s11, %s1048_s15 }
 0x14e   : > { %p1051_p5 = pneg %p1050_p4  ;;  %p1057_p8 = por %p1056_p7, %p1055_p6 }
 0x150   : > { %p1058_p10 = pnand %p1057_p8, %p1051_p5 }
 0x152   : > { %1061 = shalt.err (!%p1058_p10)
}
 0x153   : > { %s1062_s16 = scalar_lea.hbm %s1423_s6, 16  ;;  %s1066_s20 = scalar_lea.hbm %s1476_s3, 32 }
 0x154   : > { %p1063_p11 = scmp.ne.s32.totalorder %s1423_s6, %s1062_s16  ;;  %p1067_p0 = scmp.lt.u32.totalorder %s1423_s6, %s1476_s3 }
 0x155   : > { %p1068_p1 = scmp.lt.u32.totalorder %s1066_s20, %s1062_s16  ;;  %p1070_p4 = scmp.lt.u32.totalorder %s1062_s16, %s1423_s6 }
 0x156   : > { %p1064_p12 = pnand %p1063_p11, %p1216_p3 }
 0x157   : > { %p1069_p2 = por %p1068_p1, %p1067_p0 }
 0x158   : > { %p1065_p13 = pneg %p1064_p12 }
 0x159   : > { %p1071_p5 = por %p1070_p4, %p1069_p2 }
 0x15b   : > { %p1072_p6 = pnand %p1071_p5, %p1065_p13 }
 0x15d   : > { %1075 = shalt.err (!%p1072_p6)
}
 0x15e   : > { %941 = dma.vmem_to_hbm [thread:$0]  (%p1216_p3), %s776_s7, 16, %s1423_s6, %s763_s8  }
 0x15f PF: > { %p947_p7 = scmp.ge.s32.totalorder %s1142_s19, 2  ;;  %s787_s27 = sand.u32 1, %s1114_s12  }
 0x160   : > { %s788_s30 = scalar_lea.sflag [#allocation4], %s787_s27 }
 0x161   : > { %p944_p8 = pnand %p947_p7, %p1226_p9 }
 0x163   : > { %1109 = dma.done.wait (!%p944_p8), %s788_s30, 16  }
 0x164   : > { %1111 = vsyncadd (!%p944_p8), %s788_s30, 4294967280  ;;  %s16_s19 = sadd.s32 1, %s1142_s19   ;;  %s1481_s24 = sld [smem:[#allocation6_spill]] }
 0x165   : > { %p13_p10 = scmp.ge.s32.totalorder %s16_s19, 6   ;;  %s1482_s12 = smov %s1118_s13 }
 0x166   : > { %s1483_s13 = smov %s1122_s14  ;;  %s1484_s14 = smov %s1234_s28 }
 0x167   : > { %s1485_s15 = smov %s1134_s17  ;;  %s1486_s16 = smov %s1138_s18 }
 0x168   : > { %s1487_s17 = smov %s1490_s22  ;;  %15 = sbr.rel (!%p13_p10) target bundleno = 5 (0x5), region = 81 }
 0x16a   : > { %s1488_s18 = smov %s1481_s24 }
 0x16f   :  { %792 = vsyncpa [#allocation4], 1 }
 0x170   :  { %794 = vsyncpa [#allocation4 + $0x1], 1 }

</bundles_post_ra>
